<compile_context>
chip_gen: v5e
topology: v5e:2x2
jax: 0.10.0
libtpu: 0.0.40
codegen_flags: <defaults>
</compile_context>

<pallas_src>
import functools
import math

import jax
import jax.numpy as jnp
from jax import lax
from jax.experimental import pallas as pl
from jax.experimental.pallas import tpu as pltpu


# --------------------------------------------------------------------------
# Fused Add + LayerNorm kernel
# --------------------------------------------------------------------------
def _add_norm_kernel(x_ref, y_ref, g_ref, b_ref, o_ref, *, eps, valid_d):
    # dropout(Y) + X   (eval mode: dropout == identity)
    # TODO(synk): training-mode dropout would need pltpu.prng_seed +
    # pltpu.stateful_bernoulli masking of Y; only eval semantics implemented.
    z = (y_ref[...] + x_ref[...]).astype(jnp.float32)
    dp = z.shape[-1]
    inv_d = jnp.float32(1.0 / valid_d)

    if valid_d == dp:
        # Lane-dense path: no masking needed.
        mu = jnp.sum(z, axis=-1, keepdims=True) * inv_d
        zc = z - mu
        var = jnp.sum(zc * zc, axis=-1, keepdims=True) * inv_d
    else:
        # Feature axis was padded with zeros up to dp; exclude padded lanes
        # from the statistics (zeros already don't perturb sum(z)).
        mask = lax.broadcasted_iota(jnp.int32, z.shape, z.ndim - 1) < valid_d
        mu = jnp.sum(z, axis=-1, keepdims=True) * inv_d
        zc = z - mu
        zcm = jnp.where(mask, zc, 0.0)
        var = jnp.sum(zcm * zcm, axis=-1, keepdims=True) * inv_d

    inv = lax.rsqrt(var + eps)                                   # EUP, no divide
    out = zc * inv * g_ref[...].astype(jnp.float32) + b_ref[...].astype(jnp.float32)
    o_ref[...] = out.astype(o_ref.dtype)


# --------------------------------------------------------------------------
# Hardware introspection helpers (safe fallbacks if unavailable)
# --------------------------------------------------------------------------
def _vmem_capacity_bytes():
    try:
        info = pltpu.get_tpu_info()
        cap = int(getattr(info, "vmem_capacity_bytes", 0))
        if cap > 0:
            return cap
    except Exception:
        pass
    return 128 * 1024 * 1024  # v5e/v6e default


def _is_v5():
    try:
        return "v5" in jax.devices()[0].device_kind.lower()
    except Exception:
        return False


def _cdiv(a, b):
    return -(-a // b)


# --------------------------------------------------------------------------
# Wrapper
# --------------------------------------------------------------------------
def add_norm(x, y, gamma, beta, *, eps=1e-5):
    """Fused AddNorm: LayerNorm(y + x) over the last axis (eval mode only).

    x, y: (..., D);  gamma, beta: (D,).  Returns same shape/dtype as x.
    """
    assert x.shape == y.shape, (x.shape, y.shape)
    assert x.dtype == y.dtype, (x.dtype, y.dtype)   # avoid silent mixed-precision
    D = x.shape[-1]
    assert gamma.shape == (D,) and beta.shape == (D,)

    orig_shape = x.shape
    M = math.prod(orig_shape[:-1]) if len(orig_shape) > 1 else 1

    # ---- Lane-dense feature axis: pad D up to a multiple of 128. ----------
    Dp = 128 * _cdiv(D, 128)
    x2 = x.reshape(M, D)
    y2 = y.reshape(M, D)
    g2 = gamma.reshape(1, D)
    b2 = beta.reshape(1, D)
    if Dp != D:
        pad = ((0, 0), (0, Dp - D))
        x2 = jnp.pad(x2, pad)
        y2 = jnp.pad(y2, pad)
        g2 = jnp.pad(g2, pad)   # padded gamma/beta = 0 -> padded output lanes = 0
        b2 = jnp.pad(b2, pad)

    # ---- Row tile selection (dtype- and generation-aware). ----------------
    itemsize = jnp.dtype(x.dtype).itemsize
    pack = {4: 8, 2: 16, 1: 32}.get(itemsize, 8)     # native sublane packing

    vmem_cap = _vmem_capacity_bytes()
    # Spend ~1/3 of physical VMEM on this kernel's buffers, capped at 48 MiB:
    #   128 MiB (v5e/v6e) -> ~42 MiB;  64 MiB (v7x) -> ~21 MiB.
    budget = min(vmem_cap // 3, 48 << 20)

    # Per-row bytes: x/y/out pipelined (double-buffered) + ~3 f32 temps in-kernel.
    bytes_per_row = Dp * (itemsize * 3 * 2 + 4 * 3)
    tm_cap = 512 if _is_v5() else 1024
    tm = min(M, tm_cap, max(pack, budget // max(bytes_per_row, 1)))
    if tm < M:
        tm = max(pack, (tm // pack) * pack)

    # ---- Ensure an even (>=2), roughly balanced step count (v7x 2 TCs). ---
    n_steps = _cdiv(M, tm)
    if M >= 2 * pack and (n_steps == 1 or n_steps % 2):
        n_steps = max(2, n_steps + (n_steps % 2))
        tm = min(tm, pack * _cdiv(_cdiv(M, n_steps), pack))
    grid = (_cdiv(M, tm),)

    # ---- Raise the scoped VMEM limit to cover the chosen tile. ------------
    pipelined = 2 * 3 * tm * Dp * itemsize + 2 * 2 * Dp * itemsize  # x,y,out + g,b
    temps = 3 * tm * Dp * 4
    vmem_limit = int(min(vmem_cap, max(pipelined + temps + (8 << 20), 32 << 20)))

    out2 = pl.pallas_call(
        functools.partial(_add_norm_kernel, eps=eps, valid_d=D),
        out_shape=jax.ShapeDtypeStruct((M, Dp), x.dtype),
        grid=grid,
        in_specs=[
            pl.BlockSpec((tm, Dp), lambda i: (i, 0)),   # X rows
            pl.BlockSpec((tm, Dp), lambda i: (i, 0)),   # Y rows
            pl.BlockSpec((1, Dp), lambda i: (0, 0)),    # gamma (broadcast)
            pl.BlockSpec((1, Dp), lambda i: (0, 0)),    # beta  (broadcast)
        ],
        out_specs=pl.BlockSpec((tm, Dp), lambda i: (i, 0)),
        compiler_params=pltpu.CompilerParams(
            dimension_semantics=("parallel",),          # rows shard across TCs
            vmem_limit_bytes=vmem_limit),
    )(x2, y2, g2, b2)

    if Dp != D:
        out2 = out2[:, :D]
    return out2.reshape(orig_shape)


# --------------------------------------------------------------------------
if __name__ == "__main__":
    key = jax.random.PRNGKey(0)
    kx, ky, kg, kb = jax.random.split(key, 4)

    # Small shapes consistent with AddNorm: (batch, seq, normalized_shape).
    B, S, D = 2, 8, 128
    X = jax.random.normal(kx, (B, S, D), jnp.float32)
    Y = jax.random.normal(ky, (B, S, D), jnp.float32)
    gamma = 1.0 + 0.1 * jax.random.normal(kg, (D,), jnp.float32)
    beta = 0.1 * jax.random.normal(kb, (D,), jnp.float32)

    out = add_norm(X, Y, gamma, beta)
    out = jax.block_until_ready(out)

    # Pure-JAX reference (eval-mode AddNorm) for a correctness check.
    z = X + Y
    mu = jnp.mean(z, axis=-1, keepdims=True)
    var = jnp.mean((z - mu) ** 2, axis=-1, keepdims=True)
    ref = (z - mu) * lax.rsqrt(var + 1e-5) * gamma + beta

    assert out.shape == X.shape and out.dtype == jnp.float32
    assert jnp.allclose(out, ref, atol=1e-5, rtol=1e-5)
    print("KERNEL_OK")
</pallas_src>

<mosaic_0001>
module attributes {stable_mosaic.version = 11 : i64} {
  func.func @_add_norm_kernel(%arg0: i32, %arg1: memref<8x128xf32, #tpu.memory_space<vmem>>, %arg2: memref<8x128xf32, #tpu.memory_space<vmem>>, %arg3: memref<1x128xf32, #tpu.memory_space<vmem>>, %arg4: memref<1x128xf32, #tpu.memory_space<vmem>>, %arg5: memref<8x128xf32, #tpu.memory_space<vmem>>) attributes {dimension_semantics = [#tpu.dimension_semantics<parallel>], iteration_bounds = array<i64: 2>, scalar_prefetch = 0 : i64, scratch_operands = 0 : i64, tpu.core_type = #tpu.core_type<tc>, window_params = [{transform_indices = @transform_0, window_bounds = array<i64: 8, 128>}, {transform_indices = @transform_1, window_bounds = array<i64: 8, 128>}, {pipeline_mode = #tpu.pipeline_mode<synchronous>, transform_indices = @transform_2, window_bounds = array<i64: 1, 128>}, {pipeline_mode = #tpu.pipeline_mode<synchronous>, transform_indices = @transform_3, window_bounds = array<i64: 1, 128>}, {transform_indices = @transform_4, window_bounds = array<i64: 8, 128>}]} {
    %c0 = arith.constant 0 : index
    %c0_0 = arith.constant 0 : index
    %0 = vector.load %arg2[%c0, %c0_0] : memref<8x128xf32, #tpu.memory_space<vmem>>, vector<8x128xf32>
    %c0_1 = arith.constant 0 : index
    %c0_2 = arith.constant 0 : index
    %1 = vector.load %arg1[%c0_1, %c0_2] : memref<8x128xf32, #tpu.memory_space<vmem>>, vector<8x128xf32>
    %2 = arith.addf %0, %1 : vector<8x128xf32>
    %cst = arith.constant dense<0.000000e+00> : vector<8xf32>
    %3 = vector.multi_reduction <add>, %2, %cst [1] : vector<8x128xf32> to vector<8xf32>
    %4 = vector.shape_cast %3 : vector<8xf32> to vector<8x1xf32>
    %cst_3 = arith.constant 7.812500e-03 : f32
    %5 = vector.broadcast %cst_3 : f32 to vector<8x1xf32>
    %6 = arith.mulf %4, %5 : vector<8x1xf32>
    %7 = vector.broadcast %6 : vector<8x1xf32> to vector<8x128xf32>
    %8 = arith.subf %2, %7 : vector<8x128xf32>
    %9 = arith.mulf %8, %8 : vector<8x128xf32>
    %cst_4 = arith.constant dense<0.000000e+00> : vector<8xf32>
    %10 = vector.multi_reduction <add>, %9, %cst_4 [1] : vector<8x128xf32> to vector<8xf32>
    %11 = vector.shape_cast %10 : vector<8xf32> to vector<8x1xf32>
    %cst_5 = arith.constant 7.812500e-03 : f32
    %12 = vector.broadcast %cst_5 : f32 to vector<8x1xf32>
    %13 = arith.mulf %11, %12 : vector<8x1xf32>
    %cst_6 = arith.constant 9.99999974E-6 : f32
    %14 = vector.broadcast %cst_6 : f32 to vector<8x1xf32>
    %15 = arith.addf %13, %14 : vector<8x1xf32>
    %16 = math.rsqrt %15 : vector<8x1xf32>
    %17 = vector.broadcast %16 : vector<8x1xf32> to vector<8x128xf32>
    %18 = arith.mulf %8, %17 : vector<8x128xf32>
    %c0_7 = arith.constant 0 : index
    %c0_8 = arith.constant 0 : index
    %19 = vector.load %arg3[%c0_7, %c0_8] : memref<1x128xf32, #tpu.memory_space<vmem>>, vector<1x128xf32>
    %20 = vector.broadcast %19 : vector<1x128xf32> to vector<8x128xf32>
    %21 = arith.mulf %18, %20 : vector<8x128xf32>
    %c0_9 = arith.constant 0 : index
    %c0_10 = arith.constant 0 : index
    %22 = vector.load %arg4[%c0_9, %c0_10] : memref<1x128xf32, #tpu.memory_space<vmem>>, vector<1x128xf32>
    %23 = vector.broadcast %22 : vector<1x128xf32> to vector<8x128xf32>
    %24 = arith.addf %21, %23 : vector<8x128xf32>
    %c0_11 = arith.constant 0 : index
    %c0_12 = arith.constant 0 : index
    %25 = vector.load %arg5[%c0_11, %c0_12] : memref<8x128xf32, #tpu.memory_space<vmem>>, vector<8x128xf32>
    tpu.vector_store %arg5[%c0_11, %c0_12], %24 {strides = array<i32>} : memref<8x128xf32, #tpu.memory_space<vmem>>, vector<8x128xf32>,
    return
  }
  func.func @transform_0(%arg0: i32) -> (i32, i32) {
    %c0_i32 = arith.constant 0 : i32
    %c0_i32_0 = arith.constant 0 : i32
    return %arg0, %c0_i32 : i32, i32
  }
  func.func @transform_1(%arg0: i32) -> (i32, i32) {
    %c0_i32 = arith.constant 0 : i32
    %c0_i32_0 = arith.constant 0 : i32
    return %arg0, %c0_i32 : i32, i32
  }
  func.func @transform_2(%arg0: i32) -> (i32, i32) {
    %c0_i32 = arith.constant 0 : i32
    %c0_i32_0 = arith.constant 0 : i32
    %c0_i32_1 = arith.constant 0 : i32
    return %c0_i32, %c0_i32_0 : i32, i32
  }
  func.func @transform_3(%arg0: i32) -> (i32, i32) {
    %c0_i32 = arith.constant 0 : i32
    %c0_i32_0 = arith.constant 0 : i32
    %c0_i32_1 = arith.constant 0 : i32
    return %c0_i32, %c0_i32_0 : i32, i32
  }
  func.func @transform_4(%arg0: i32) -> (i32, i32) {
    %c0_i32 = arith.constant 0 : i32
    %c0_i32_0 = arith.constant 0 : i32
    return %arg0, %c0_i32 : i32, i32
  }
}

</mosaic_0001>

<bundles_post_ra>
// kernel: tpu_custom_call.1
= control target key start
LH: loop header
LB: loop body
LE: loop exit
PB: predicated region body
PF: predicated region fallthrough
CT: control target
= control target key end

     0   :  { %s795_s0 = inlined_call_operand.hbm [shape: f32[16,128], index: 0, kind: input, shape index: {}]   ;;  %s796_s1 = inlined_call_operand.hbm [shape: f32[16,128], index: 1, kind: input, shape index: {}]   ;;  %s797_s2 = inlined_call_operand.vmem [shape: f32[1,128], index: 2, kind: input, shape index: {}]   ;;  %s798_s3 = inlined_call_operand.vmem [shape: f32[1,128], index: 3, kind: input, shape index: {}]   ;;  %s799_s4 = inlined_call_operand.hbm [shape: f32[16,128], index: 4, kind: output, shape index: {}]  }
   0x1   :  { %800 = sst [smem:[#allocation11_spill]] %s795_s0 }
   0x2   :  { %9 = vsyncpa [#allocation3], 0 }
   0x3   :  { %11 = vsyncpa [#allocation3 + $0x1], 0 }
   0x4   :  { %12 = vsyncpa [#allocation6], 0 }
   0x5   :  { %14 = vsyncpa [#allocation6 + $0x1], 0 }
   0x6   :  { %15 = vsyncpa [#allocation4], 0 }
   0x7   :  { %17 = vsyncpa [#allocation4 + $0x1], 0  ;;  %s624_s15 = smov 0   ;;  %s626_s16 = smov 0  }
   0x8   :  { %s628_s17 = smov 0   ;;  %s630_s18 = smov 0  }
   0x9 LB: > { %s645_s19 = sadd.s32 4294967295, %s597_s18   ;;  %s397_s20 = sadd.s32 4294967294, %s597_s18   ;;  %s597_s18 = sphi %s630_s18, %s812_s18   ;;  %s593_s17 = sphi %s628_s17, %s811_s17   ;;  %s589_s16 = sphi %s626_s16, %s810_s16   ;;  %s585_s15 = sphi %s624_s15, %s809_s15  }
   0xa   : > { %s649_s21 = sadd.s32 1, %s597_s18   ;;  %s30_s22 = sadd.s32 1, %s593_s17 }
   0xb   : > { %s27_s23 = ssub.s32 %s597_s18, %s649_s21  ;;  %p37_p0 = scmp.ne.s32.totalorder %s593_s17, %s589_s16 }
   0xc   : > { %p28_p1 = scmp.eq.s32.totalorder %s27_s23, 0  ;;  %p38_p2 = scmp.eq.s32.totalorder %s597_s18, 0 }
   0xd   : > { %p43_p3 = scmp.ne.s32.totalorder %s589_s16, %s585_s15  ;;  %p44_p4 = scmp.eq.s32.totalorder %s645_s19, 0 }
   0xe   : > { %s661_s24 = scalar_select %p28_p1, %s593_s17, %s30_s22  }
   0xf   : > { %p663_p5 = por %p38_p2, %p37_p0  ;;  %p667_p6 = por %p44_p4, %p43_p3 }
  0x10   : > { %p135_p7 = scmp.eq.s32.totalorder %s645_s19, 1  ;;  %p141_p8 = scmp.eq.s32.totalorder %s397_s20, 1 }
  0x11   : > { %p429_p10 = scmp.lt.s32.totalorder %s597_s18, 2  ;;  %s683_s29 = sand.u32 1, %s593_s17  }
  0x12   : > { %p674_p11 = por %p135_p7, %p37_p0  ;;  %p678_p12 = por %p141_p8, %p43_p3 }
  0x13   : > { %s401_s30 = sshll.u32 %s597_s18, 3  ;;  %s400_s5 = sshll.u32 %s683_s29, 3 }
  0x14   : > { %s805_s0 = sld [smem:[#allocation11_spill]]  ;;  %s171_s10 = scalar_lea.vmem [#allocation2], %s400_s5 }
  0x15   : > { %s179_s11 = sshll.u32 %s171_s10, 4  ;;  %p692_p13 = pnand %p429_p10, %p663_p5  ;;  %s180_s11 = int_to_ptr.vmem [resolvable:$true] %s179_s11 }
  0x16   : > { %p404_p0 = scmp.ge.s32.totalorder %s597_s18, 1  ;;  %p203_p1 = scmp.lt.s32.totalorder %s597_s18, 3 }
  0x17   : > { %s168_s13 = scalar_lea.sflag [#allocation3], %s683_s29  ;;  %p471_p3 = pneg %p692_p13 }
  0x1a   : > { %s175_s8 = scalar_lea.hbm %s805_s0, %s401_s30  ;;  %s474_s25 = scalar_lea.hbm %s805_s0, 16 }
  0x1b   : > { %s177_s9 = sshll.u32 %s175_s8, 4  ;;  %s178_s9 = int_to_ptr.hbm [resolvable:$true] %s177_s9 }
  0x1c   : > { %s467_s14 = sshra.s32 %s178_s9, 4  ;;  %s468_s14 = int_to_ptr.hbm [resolvable:$true] %s467_s14 }
  0x1d   : > { %s469_s20 = scalar_lea.hbm %s468_s14, 8  ;;  %p475_p5 = scmp.lt.s32.totalorder %s468_s14, %s805_s0 }
  0x1e   : > { %p470_p2 = scmp.ne.s32.totalorder %s468_s14, %s469_s20  ;;  %p476_p8 = scmp.lt.s32.totalorder %s474_s25, %s469_s20 }
  0x20   : > { %p472_p4 = pnand %p471_p3, %p470_p2  ;;  %p477_p10 = por %p476_p8, %p475_p5 }
  0x22   : > { %p473_p7 = pneg %p472_p4 }
  0x24   : > { %p478_p9 = pnand %p477_p10, %p473_p7 }
  0x26   : > { %481 = shalt.err (!%p478_p9)
}
  0x27   : > { %421 = dma.hbm_to_vmem [thread:$0]  (!%p692_p13), %s178_s9, 128, %s180_s11, %s168_s13  }
  0x28   : > { %p716_p2 = pnand %p404_p0, %p203_p1  ;;  %s194_s14 = scalar_lea.hbm %s796_s1, %s401_s30 }
  0x29   : > { %s196_s20 = sshll.u32 %s194_s14, 4  ;;  %s190_s23 = scalar_lea.vmem [#allocation5], %s400_s5  ;;  %s197_s20 = int_to_ptr.hbm [resolvable:$true] %s196_s20 }
  0x2a   : > { %s198_s25 = sshll.u32 %s190_s23, 4  ;;  %s187_s6 = scalar_lea.sflag [#allocation6], %s683_s29  ;;  %s199_s25 = int_to_ptr.vmem [resolvable:$true] %s198_s25 }
  0x2b   : > { %s497_s7 = sshra.s32 %s197_s20, 4  ;;  %s504_s13 = scalar_lea.hbm %s796_s1, 16  ;;  %s498_s7 = int_to_ptr.hbm [resolvable:$true] %s497_s7 }
  0x2c   : > { %s499_s0 = scalar_lea.hbm %s498_s7, 8  ;;  %p505_p4 = scmp.lt.s32.totalorder %s498_s7, %s796_s1 }
  0x2d   : > { %p500_p9 = scmp.ne.s32.totalorder %s498_s7, %s499_s0  ;;  %p506_p7 = scmp.lt.s32.totalorder %s504_s13, %s499_s0 }
  0x2f   : > { %p502_p0 = pnand %p500_p9, %p471_p3  ;;  %p507_p5 = por %p506_p7, %p505_p4 }
  0x31   : > { %p503_p1 = pneg %p502_p0 }
  0x33   : > { %p508_p8 = pnand %p507_p5, %p503_p1 }
  0x35   : > { %511 = shalt.err (!%p508_p8)
}
  0x36   : > { %424 = dma.hbm_to_vmem [thread:$0]  (!%p692_p13), %s197_s20, 128, %s199_s25, %s187_s6  }
  0x37   : > { %207 = sbr.rel (%p716_p2) target bundleno = 335 (0x14f), region = 36  ;;  %s738_s29 = sand.u32 (!%p716_p2), 1, %s589_s16  }
  0x38   : > { %s741_s5 = sshll.u32 (!%p716_p2), %s738_s29, 3  ;;  %s210_s22 = scalar_lea.sflag (!%p716_p2), [#allocation3], %s738_s29 }
  0x39   : > { %s213_s0 = scalar_lea.vmem (!%p716_p2), [#allocation2], %s741_s5 }
  0x3c   : > { %572 = dma.done.wait (%p667_p6), %s210_s22, 128  }
  0x3d   : > { %574 = vsyncadd (%p667_p6), %s210_s22, 4294967168  ;;  %s220_s12 = scalar_lea.sflag [#allocation6], %s738_s29  ;;  %s223_s8 = scalar_lea.vmem [#allocation5], %s741_s5 }
  0x3e   : > { %576 = dma.done.wait (%p667_p6), %s220_s12, 128  }
  0x3f   : > { %578 = vsyncadd (%p667_p6), %s220_s12, 4294967168  ;;  %v254_v0 = vld [vmem:[%s223_s8] sm:$0xff]  ;;  %v255_v1 = vld [vmem:[%s213_s0] sm:$0xff]  ;;  %s409_s26 = sshll.u32 %s645_s19, 3  ;;  %s253_s19 = scalar_lea.vmem [#allocation7], %s741_s5 }
  0x40   : > { %v256_v2 = vadd.f32 %v255_v1, %v254_v0  ;;  %v463_v16 = vld [vmem:[%s797_s2] ss:$0 sm:$0xff]  ;;  %s299_s6 = scalar_lea.hbm %s799_s4, %s409_s26  ;;  %s301_s11 = sshll.u32 %s253_s19, 4  ;;  %s302_s11 = int_to_ptr.vmem [resolvable:$true] %s301_s11 }
  0x41   : > { %v464_v19 = vld [vmem:[%s798_s3] ss:$0 sm:$0xff]  ;;  %s303_s13 = sshll.u32 %s299_s6, 4  ;;  %s289_s10 = scalar_lea.sflag [#allocation4], %s738_s29  ;;  %s304_s13 = int_to_ptr.hbm [resolvable:$true] %s303_s13 }
  0x42   : > { %257 = vadd.xlane.f32.xlu0 %v256_v2  ;;  %s541_s30 = sshra.s32 %s304_s13, 4  ;;  %s547_s8 = scalar_lea.hbm %s799_s4, 16  ;;  %s542_s30 = int_to_ptr.hbm [resolvable:$true] %s541_s30 }
  0x43   : > { %s543_s22 = scalar_lea.hbm %s542_s30, 8  ;;  %p548_p10 = scmp.lt.s32.totalorder %s542_s30, %s799_s4 }
  0x44   : > { %p544_p6 = scmp.ne.s32.totalorder %s542_s30, %s543_s22  ;;  %p549_p2 = scmp.lt.s32.totalorder %s547_s8, %s543_s22 }
  0x46   : > { %p545_p13 = pnand %p544_p6, %p674_p11  ;;  %p550_p9 = por %p549_p2, %p548_p10 }
  0x48   : > { %p546_p3 = pneg %p545_p13 }
  0x4a   : > { %p551_p0 = pnand %p550_p9, %p546_p3 }
  0xb5   : > { %v258_v3 = vpop.xlane.xlu0 %257 }
  0xb6   : > { %v259_v4 = vmul.f32 0.0078125, %v258_v3 }
  0xb8   : > { %v260_v5 = vsub.f32 %v256_v2, %v259_v4 }
  0xba   : > { %v261_v6 = vmul.f32 %v260_v5, %v260_v5 }
  0xbc   : > { %262 = vadd.xlane.f32.xlu0 %v261_v6 }
 0x12f   : > { %v263_v7 = vpop.xlane.xlu0 %262 }
 0x130   : > { %v264_v8 = vmul.f32 0.0078125, %v263_v7 }
 0x132   : > { %v265_v9 = vadd.f32 1e-05, %v264_v8 }
 0x134   : > { %465 = vrsqrt.f32 %v265_v9  ;;  %vm272_vm1 = vweird.f32 %v265_v9 }
 0x13a   : > { %v466_v10 = vpop.eup %465 }
 0x13b   : > { %v267_v11 = vmul.f32 %v466_v10, %v265_v9  ;;  %vm273_vm0 = vweird.f32 %v466_v10 }
 0x13c   : > { %vm274_vm2 = vmor %vm272_vm1, %vm273_vm0 }
 0x13d   : > { %v268_v12 = vmul.f32 %v466_v10, %v267_v11 }
 0x13f   : > { %v269_v13 = vmul.f32 0.5, %v268_v12 }
 0x141   : > { %v270_v14 = vsub.f32 1.5, %v269_v13 }
 0x143   : > { %v271_v15 = vmul.f32 %v466_v10, %v270_v14 }
 0x145   : > { %v275_v17 = vsel %vm274_vm2, %v466_v10, %v271_v15 }
 0x146   : > { %v276_v18 = vmul.f32 %v275_v17, %v260_v5 }
 0x148   : > { %v281_v20 = vmul.f32 %v463_v16, %v276_v18 }
 0x14a   : > { %v286_v21 = vadd.f32 %v464_v19, %v281_v20 }
 0x14c   : > { %287 = vst [vmem:[%s253_s19] sm:$0xff] %v286_v21 }
 0x14d   : > { %554 = shalt.err (!%p551_p0)
}
 0x14e   : > { %416 = dma.vmem_to_hbm [thread:$0]  (%p674_p11), %s302_s11, 128, %s304_s13, %s289_s10  }
 0x14f PF: > { %s315_s29 = sand.u32 1, %s585_s15   ;;  %p808_p1 = scmp.ge.s32.totalorder %s597_s18, 2 }
 0x150   : > { %s316_s14 = scalar_lea.sflag [#allocation4], %s315_s29 }
 0x151   : > { %p426_p4 = pnand %p808_p1, %p678_p12 }
 0x153   : > { %p427_p7 = pneg %p426_p4 }
 0x155   : > { %580 = dma.done.wait (%p427_p7), %s316_s14, 128  }
 0x156   : > { %582 = vsyncadd (%p427_p7), %s316_s14, 4294967168  ;;  %p20_p5 = scmp.ge.s32.totalorder %s649_s21, 4   ;;  %s809_s15 = smov %s589_s16 }
 0x157   : > { %s810_s16 = smov %s593_s17  ;;  %s811_s17 = smov %s661_s24 }
 0x158   : > { %s812_s18 = smov %s649_s21  ;;  %22 = sbr.rel (!%p20_p5) target bundleno = 9 (0x9), region = 94 }
 0x15d   :  { %322 = vsyncpa [#allocation3], 1 }
 0x15e   :  { %324 = vsyncpa [#allocation3 + $0x1], 1 }
 0x15f   :  { %325 = vsyncpa [#allocation6], 1 }
 0x160   :  { %327 = vsyncpa [#allocation6 + $0x1], 1 }
 0x161   :  { %328 = vsyncpa [#allocation4], 1 }
 0x162   :  { %330 = vsyncpa [#allocation4 + $0x1], 1 }

</bundles_post_ra>
